<compile_context>
chip_gen: v7x
topology: tpu7x:2x2x1
jax: 0.10.0
libtpu: 0.0.40
codegen_flags: <defaults>
</compile_context>

<pallas_src>
import functools
import math

import jax
import jax.numpy as jnp
from jax.experimental import pallas as pl
from jax.experimental.pallas import tpu as pltpu

LN_EPS = 1e-12  # BERT LayerNorm eps


def _layernorm(x, gamma, beta):
    mean = jnp.mean(x, axis=-1, keepdims=True)
    var = jnp.mean(jnp.square(x - mean), axis=-1, keepdims=True)
    return (x - mean) * jax.lax.rsqrt(var + LN_EPS) * gamma + beta


def _gelu(x):
    # exact (erf-based) GELU, matching torch.nn.functional.gelu default.
    # (tanh-approx would move the transcendental to the EUP slot on v6e/v7x
    #  but deviates from the module's exact-gelu semantics, so keep erf.)
    return 0.5 * x * (1.0 + jax.lax.erf(x * (1.0 / math.sqrt(2.0))))


# ----------------------------- Pallas kernels -------------------------------

def _emb_ln_kernel(w_ref, t_ref, p_ref, g_ref, b_ref, o_ref):
    # w/t: (1, S, H) gathered word / token-type embeddings for one batch
    # element; p: (S, H) position embeddings; gamma/beta: (1, H).
    # Fused sum + LayerNorm: avoids writing + re-reading a B*S*H f32
    # intermediate through HBM (memory-bound stage).
    x = w_ref[0] + t_ref[0] + p_ref[...]
    o_ref[0] = _layernorm(x, g_ref[...], b_ref[...])


def _bert_layer_kernel(num_heads, head_dim, heads_per_group,
                       h_ref, m_ref,
                       wqkv_ref, bqkv_ref,
                       wao_ref, bao_ref, g1_ref, be1_ref,
                       wi_ref, bi_ref, wff_ref, bff_ref, g2_ref, be2_ref,
                       o_ref, ctx_ref):
    x = h_ref[0]                    # (S, H) f32
    S, H = x.shape
    mask = m_ref[0]                 # (1, S) additive attention mask (f32)
    # Hoist the mask broadcast out of the per-head loop (JAX does not CSE it).
    mask_b = pl.broadcast_to(mask, (S, S))

    # Fused QKV projection: one bf16 MXU pass with N = 3H, f32 accumulation.
    # The 1/sqrt(head_dim) attention scale is already folded into the Q
    # columns of wqkv / bqkv at parameter-pack time.
    x16 = x.astype(jnp.bfloat16)
    qkv = (jnp.dot(x16, wqkv_ref[...], preferred_element_type=jnp.float32)
           + bqkv_ref[...]).astype(jnp.bfloat16)        # (S, 3H) bf16
    q = qkv[:, :H]
    k = qkv[:, H:2 * H]
    v = qkv[:, 2 * H:]

    # Heads are processed in lane-aligned groups (heads_per_group*head_dim is
    # >= 128 lanes or the full hidden width), so every ctx store is an
    # unmasked lane-dense vst and the static unroll is num_heads/group.
    # Static (not fori_loop) because lane-dim slice offsets must be constants.
    num_groups = num_heads // heads_per_group
    group_width = heads_per_group * head_dim
    for g in range(num_groups):
        parts = []
        for hh in range(heads_per_group):
            h = g * heads_per_group + hh
            sl = slice(h * head_dim, (h + 1) * head_dim)
            qh, kh, vh = q[:, sl], k[:, sl], v[:, sl]
            # scores = qh @ kh^T without materializing an explicit transpose.
            s = jax.lax.dot_general(qh, kh, (((1,), (1,)), ((), ())),
                                    preferred_element_type=jnp.float32)
            s = s + mask_b          # scale already folded into Q weights
            s = s - jnp.max(s, axis=-1, keepdims=True)
            p = jnp.exp(s)
            denom = jnp.sum(p, axis=-1, keepdims=True)          # (S, 1)
            ctx_h = jnp.dot(p.astype(jnp.bfloat16), vh,
                            preferred_element_type=jnp.float32)  # (S, hd)
            # Normalize the small (S, head_dim) context (EUP reciprocal)
            # instead of the (S, S) probability matrix.
            ctx_h = ctx_h * pl.reciprocal(denom, approx=True)
            parts.append(ctx_h.astype(jnp.bfloat16))
        block = parts[0] if heads_per_group == 1 else jnp.concatenate(parts, axis=1)
        ctx_ref[:, g * group_width:(g + 1) * group_width] = block

    attn = (jnp.dot(ctx_ref[...], wao_ref[...],
                    preferred_element_type=jnp.float32) + bao_ref[...])
    h1 = _layernorm(attn + x, g1_ref[...], be1_ref[...])

    inter = _gelu(jnp.dot(h1.astype(jnp.bfloat16), wi_ref[...],
                          preferred_element_type=jnp.float32) + bi_ref[...])
    ff = (jnp.dot(inter.astype(jnp.bfloat16), wff_ref[...],
                  preferred_element_type=jnp.float32) + bff_ref[...])
    o_ref[0] = _layernorm(ff + h1, g2_ref[...], be2_ref[...])


def _pooler_kernel(x_ref, w_ref, b_ref, o_ref):
    o_ref[...] = jnp.tanh(
        jnp.dot(x_ref[...].astype(jnp.bfloat16), w_ref[...],
                preferred_element_type=jnp.float32) + b_ref[...])


# ------------------------------ wrappers -------------------------------------

def embeddings_layernorm(word_e, tok_e, pos_e, gamma, beta):
    B, S, H = word_e.shape
    return pl.pallas_call(
        _emb_ln_kernel,
        grid_spec=pltpu.PrefetchScalarGridSpec(
            num_scalar_prefetch=0,
            grid=(B,),
            in_specs=[pl.BlockSpec((1, S, H), lambda b: (b, 0, 0)),
                      pl.BlockSpec((1, S, H), lambda b: (b, 0, 0)),
                      pl.BlockSpec((S, H), lambda b: (0, 0)),
                      pl.BlockSpec((1, H), lambda b: (0, 0)),
                      pl.BlockSpec((1, H), lambda b: (0, 0))],
            out_specs=pl.BlockSpec((1, S, H), lambda b: (b, 0, 0)),
        ),
        out_shape=jax.ShapeDtypeStruct((B, S, H), jnp.float32),
        compiler_params=pltpu.CompilerParams(
            dimension_semantics=("parallel",)),
    )(word_e, tok_e, pos_e, gamma, beta)


_LAYER_PARAM_ORDER = ("wqkv", "bqkv",
                      "wao", "bao", "g1", "be1",
                      "wi", "bi", "wff", "bff", "g2", "be2")


def _const_spec(a):
    # Weight block: same tile every grid step (index_map constant over batch).
    # TODO(synk): pipeline_mode=pl.Buffered(1) here would single-buffer the
    # ~13.5 MiB of bf16 BERT-base layer weights (v7x VMEM headroom).
    ndim = a.ndim

    def index_map(b):
        return (0,) * ndim

    return pl.BlockSpec(a.shape, index_map)


def bert_layer(hidden, mask_add, lp, num_heads):
    B, S, H = hidden.shape
    head_dim = H // num_heads
    # Process enough heads per group so group stores span >= 128 lanes (or the
    # full hidden width when H < 128).
    heads_per_group = max(1, min(num_heads, 128 // max(1, head_dim)))
    while num_heads % heads_per_group:
        heads_per_group -= 1
    weights = [lp[name] for name in _LAYER_PARAM_ORDER]

    grid_spec = pltpu.PrefetchScalarGridSpec(
        num_scalar_prefetch=0,
        grid=(B,),  # one program per batch element
        in_specs=[pl.BlockSpec((1, S, H), lambda b: (b, 0, 0)),
                  pl.BlockSpec((1, 1, S), lambda b: (b, 0, 0))]
                 + [_const_spec(w) for w in weights],
        out_specs=pl.BlockSpec((1, S, H), lambda b: (b, 0, 0)),
        scratch_shapes=[pltpu.VMEM((S, H), jnp.bfloat16)],  # ctx accumulator
    )
    kernel = functools.partial(_bert_layer_kernel, num_heads, head_dim,
                               heads_per_group)
    return pl.pallas_call(
        kernel,
        grid_spec=grid_spec,
        out_shape=jax.ShapeDtypeStruct((B, S, H), jnp.float32),
        compiler_params=pltpu.CompilerParams(
            dimension_semantics=("parallel",),   # shard batch over TCs (v7x)
            # 48 MiB: leaves headroom on v7x's 64 MiB physical VMEM while
            # staying comfortably inside v5e/v6e's 128 MiB.
            vmem_limit_bytes=48 << 20),
    )(hidden, mask_add, *weights)


def bert_pooler(first_tok, wp, bp):
    B, H = first_tok.shape
    return pl.pallas_call(
        _pooler_kernel,
        out_shape=jax.ShapeDtypeStruct((B, H), jnp.float32),
    )(first_tok, wp, bp)


def bert_model_forward(params, input_ids, token_type_ids, attention_mask, cfg):
    B, S = input_ids.shape
    if attention_mask is None:
        attention_mask = jnp.ones_like(input_ids)
    if token_type_ids is None:
        token_type_ids = jnp.zeros_like(input_ids)

    # extended_attention_mask = (1 - mask) * -10000, broadcast over heads / q-pos
    mask_add = ((1.0 - attention_mask.astype(jnp.float32)) * -10000.0).reshape(B, 1, S)

    # BertEmbeddings: word / position / token_type gathers stay in XLA glue;
    # the sum + LayerNorm is fused in one Pallas kernel (dropout = identity).
    word_e = params["word_emb"][input_ids]          # (B, S, H)
    tok_e = params["tok_emb"][token_type_ids]       # (B, S, H)
    pos_e = params["pos_emb"][:S]                   # (S, H)
    hidden = embeddings_layernorm(word_e, tok_e, pos_e,
                                  params["emb_ln_g"], params["emb_ln_b"])

    for lp in params["layers"]:
        hidden = bert_layer(hidden, mask_add, lp, cfg["num_attention_heads"])

    encoded_layers = [hidden]  # output_all_encoded_layers=False -> last layer only
    pooled = bert_pooler(hidden[:, 0, :], params["pool_w"], params["pool_b"])
    return encoded_layers, pooled


# ------------------------- deterministic parameter init ----------------------

def init_params(key, cfg):
    H = cfg["hidden_size"]
    I = cfg["intermediate_size"]
    std = cfg["initializer_range"]
    head_dim = H // cfg["num_attention_heads"]
    attn_scale = 1.0 / math.sqrt(head_dim)

    def normal(k, shape):
        return jax.random.normal(k, shape, jnp.float32) * std

    keys = jax.random.split(key, 4 + cfg["num_hidden_layers"])
    params = {
        "word_emb": normal(keys[0], (cfg["vocab_size"], H)),
        "pos_emb": normal(keys[1], (cfg["max_position_embeddings"], H)),
        "tok_emb": normal(keys[2], (cfg["type_vocab_size"], H)),
        "emb_ln_g": jnp.ones((1, H), jnp.float32),
        "emb_ln_b": jnp.zeros((1, H), jnp.float32),
        "pool_w": normal(keys[3], (H, H)).astype(jnp.bfloat16),
        "pool_b": jnp.zeros((1, H), jnp.float32),
        "layers": [],
    }
    for li in range(cfg["num_hidden_layers"]):
        k = jax.random.split(keys[4 + li], 6)
        wq = normal(k[0], (H, H))
        wk = normal(k[1], (H, H))
        wv = normal(k[2], (H, H))
        bq = jnp.zeros((1, H), jnp.float32)
        bk = jnp.zeros((1, H), jnp.float32)
        bv = jnp.zeros((1, H), jnp.float32)
        lp = {
            # fused QKV weight (H, 3H) in bf16 with the 1/sqrt(head_dim)
            # attention scale pre-folded into the Q columns; bias stays f32.
            "wqkv": jnp.concatenate([wq * attn_scale, wk, wv],
                                    axis=1).astype(jnp.bfloat16),
            "bqkv": jnp.concatenate([bq * attn_scale, bk, bv], axis=1),
            "wao": normal(k[3], (H, H)).astype(jnp.bfloat16),
            "bao": jnp.zeros((1, H), jnp.float32),
            "g1": jnp.ones((1, H), jnp.float32), "be1": jnp.zeros((1, H), jnp.float32),
            "wi": normal(k[4], (H, I)).astype(jnp.bfloat16),
            "bi": jnp.zeros((1, I), jnp.float32),
            "wff": normal(k[5], (I, H)).astype(jnp.bfloat16),
            "bff": jnp.zeros((1, H), jnp.float32),
            "g2": jnp.ones((1, H), jnp.float32), "be2": jnp.zeros((1, H), jnp.float32),
        }
        params["layers"].append(lp)
    return params


# ------------------------- pure-JAX reference (check) ------------------------

def bert_ref(params, input_ids, token_type_ids, attention_mask, cfg):
    B, S = input_ids.shape
    H = cfg["hidden_size"]
    nh = cfg["num_attention_heads"]
    hd = H // nh
    mask_add = (1.0 - attention_mask.astype(jnp.float32))[:, None, None, :] * -10000.0
    pos_ids = jnp.arange(S)
    x = (params["word_emb"][input_ids] + params["pos_emb"][pos_ids][None]
         + params["tok_emb"][token_type_ids])
    x = _layernorm(x, params["emb_ln_g"], params["emb_ln_b"])
    for lp in params["layers"]:
        qkv = (jnp.dot(x.astype(jnp.bfloat16), lp["wqkv"],
                       preferred_element_type=jnp.float32)
               + lp["bqkv"]).astype(jnp.bfloat16)          # (B, S, 3H)
        q, k, v = qkv[..., :H], qkv[..., H:2 * H], qkv[..., 2 * H:]

        def split(t):
            return t.reshape(B, S, nh, hd).transpose(0, 2, 1, 3)

        qh, kh, vh = split(q), split(k), split(v)
        # NOTE: no /sqrt(hd) here — the scale is folded into wqkv's Q columns.
        s = jnp.einsum("bhqd,bhkd->bhqk", qh, kh,
                       preferred_element_type=jnp.float32) + mask_add
        p = jax.nn.softmax(s, axis=-1).astype(jnp.bfloat16)
        ctx = jnp.einsum("bhqk,bhkd->bhqd", p, vh,
                         preferred_element_type=jnp.float32)
        ctx = ctx.transpose(0, 2, 1, 3).reshape(B, S, H).astype(jnp.bfloat16)
        attn = jnp.dot(ctx, lp["wao"], preferred_element_type=jnp.float32) + lp["bao"]
        h1 = _layernorm(attn + x, lp["g1"], lp["be1"])
        inter = _gelu(jnp.dot(h1.astype(jnp.bfloat16), lp["wi"],
                              preferred_element_type=jnp.float32) + lp["bi"])
        ff = jnp.dot(inter.astype(jnp.bfloat16), lp["wff"],
                     preferred_element_type=jnp.float32) + lp["bff"]
        x = _layernorm(ff + h1, lp["g2"], lp["be2"])
    pooled = jnp.tanh(jnp.dot(x[:, 0, :].astype(jnp.bfloat16), params["pool_w"],
                              preferred_element_type=jnp.float32) + params["pool_b"])
    return x, pooled


# ----------------------------------- main -------------------------------------

if __name__ == "__main__":
    cfg = dict(vocab_size=64, hidden_size=64, num_hidden_layers=2,
               num_attention_heads=4, intermediate_size=128,
               max_position_embeddings=32, type_vocab_size=2,
               initializer_range=0.02)
    B, S = 2, 16

    key = jax.random.PRNGKey(0)
    kp, kid, ktt = jax.random.split(key, 3)
    params = init_params(kp, cfg)

    input_ids = jax.random.randint(kid, (B, S), 0, cfg["vocab_size"], dtype=jnp.int32)
    token_type_ids = jax.random.randint(ktt, (B, S), 0, cfg["type_vocab_size"], dtype=jnp.int32)
    attention_mask = jnp.concatenate(
        [jnp.ones((B, S - 4), jnp.int32), jnp.zeros((B, 4), jnp.int32)], axis=1)

    encoded_layers, pooled = bert_model_forward(
        params, input_ids, token_type_ids, attention_mask, cfg)
    seq_out = jax.block_until_ready(encoded_layers[-1])
    pooled = jax.block_until_ready(pooled)

    ref_seq, ref_pool = bert_ref(params, input_ids, token_type_ids, attention_mask, cfg)
    assert seq_out.shape == (B, S, cfg["hidden_size"])
    assert pooled.shape == (B, cfg["hidden_size"])
    # bf16 matmuls + approx reciprocal softmax -> loosened tolerance vs f32 path
    assert bool(jnp.allclose(seq_out, ref_seq, atol=2e-2, rtol=2e-2))
    assert bool(jnp.allclose(pooled, ref_pool, atol=2e-2, rtol=2e-2))
    print("KERNEL_OK")
</pallas_src>

<mosaic_0001>
module attributes {stable_mosaic.version = 11 : i64} {
  func.func @_emb_ln_kernel(%arg0: i32, %arg1: memref<1x16x64xf32, #tpu.memory_space<vmem>>, %arg2: memref<1x16x64xf32, #tpu.memory_space<vmem>>, %arg3: memref<16x64xf32, #tpu.memory_space<vmem>>, %arg4: memref<1x64xf32, #tpu.memory_space<vmem>>, %arg5: memref<1x64xf32, #tpu.memory_space<vmem>>, %arg6: memref<1x16x64xf32, #tpu.memory_space<vmem>>) attributes {dimension_semantics = [#tpu.dimension_semantics<parallel>], iteration_bounds = array<i64: 2>, scalar_prefetch = 0 : i64, scratch_operands = 0 : i64, tpu.core_type = #tpu.core_type<tc>, window_params = [{transform_indices = @transform_0, window_bounds = array<i64: 1, 16, 64>}, {transform_indices = @transform_1, window_bounds = array<i64: 1, 16, 64>}, {pipeline_mode = #tpu.pipeline_mode<synchronous>, transform_indices = @transform_2, window_bounds = array<i64: 16, 64>}, {pipeline_mode = #tpu.pipeline_mode<synchronous>, transform_indices = @transform_3, window_bounds = array<i64: 1, 64>}, {pipeline_mode = #tpu.pipeline_mode<synchronous>, transform_indices = @transform_4, window_bounds = array<i64: 1, 64>}, {transform_indices = @transform_5, window_bounds = array<i64: 1, 16, 64>}]} {
    %c0 = arith.constant 0 : index
    %c0_0 = arith.constant 0 : index
    %c0_1 = arith.constant 0 : index
    %0 = vector.load %arg1[%c0, %c0_0, %c0_1] : memref<1x16x64xf32, #tpu.memory_space<vmem>>, vector<1x16x64xf32>
    %1 = vector.shape_cast %0 : vector<1x16x64xf32> to vector<16x64xf32>
    %c0_2 = arith.constant 0 : index
    %c0_3 = arith.constant 0 : index
    %c0_4 = arith.constant 0 : index
    %2 = vector.load %arg2[%c0_2, %c0_3, %c0_4] : memref<1x16x64xf32, #tpu.memory_space<vmem>>, vector<1x16x64xf32>
    %3 = vector.shape_cast %2 : vector<1x16x64xf32> to vector<16x64xf32>
    %4 = arith.addf %1, %3 : vector<16x64xf32>
    %c0_5 = arith.constant 0 : index
    %c0_6 = arith.constant 0 : index
    %5 = vector.load %arg3[%c0_5, %c0_6] : memref<16x64xf32, #tpu.memory_space<vmem>>, vector<16x64xf32>
    %6 = arith.addf %4, %5 : vector<16x64xf32>
    %c0_7 = arith.constant 0 : index
    %c0_8 = arith.constant 0 : index
    %7 = vector.load %arg4[%c0_7, %c0_8] : memref<1x64xf32, #tpu.memory_space<vmem>>, vector<1x64xf32>
    %c0_9 = arith.constant 0 : index
    %c0_10 = arith.constant 0 : index
    %8 = vector.load %arg5[%c0_9, %c0_10] : memref<1x64xf32, #tpu.memory_space<vmem>>, vector<1x64xf32>
    %cst = arith.constant dense<0.000000e+00> : vector<16xf32>
    %9 = vector.multi_reduction <add>, %6, %cst [1] : vector<16x64xf32> to vector<16xf32>
    %10 = vector.shape_cast %9 : vector<16xf32> to vector<16x1xf32>
    %cst_11 = arith.constant 6.400000e+01 : f32
    %11 = vector.broadcast %cst_11 : f32 to vector<16x1xf32>
    %12 = arith.divf %10, %11 : vector<16x1xf32>
    %13 = vector.broadcast %12 : vector<16x1xf32> to vector<16x64xf32>
    %14 = arith.subf %6, %13 : vector<16x64xf32>
    %15 = arith.mulf %14, %14 : vector<16x64xf32>
    %cst_12 = arith.constant dense<0.000000e+00> : vector<16xf32>
    %16 = vector.multi_reduction <add>, %15, %cst_12 [1] : vector<16x64xf32> to vector<16xf32>
    %17 = vector.shape_cast %16 : vector<16xf32> to vector<16x1xf32>
    %cst_13 = arith.constant 6.400000e+01 : f32
    %18 = vector.broadcast %cst_13 : f32 to vector<16x1xf32>
    %19 = arith.divf %17, %18 : vector<16x1xf32>
    %20 = vector.broadcast %12 : vector<16x1xf32> to vector<16x64xf32>
    %21 = arith.subf %6, %20 : vector<16x64xf32>
    %cst_14 = arith.constant 9.99999996E-13 : f32
    %22 = vector.broadcast %cst_14 : f32 to vector<16x1xf32>
    %23 = arith.addf %19, %22 : vector<16x1xf32>
    %24 = math.rsqrt %23 : vector<16x1xf32>
    %25 = vector.broadcast %24 : vector<16x1xf32> to vector<16x64xf32>
    %26 = arith.mulf %21, %25 : vector<16x64xf32>
    %27 = vector.broadcast %7 : vector<1x64xf32> to vector<16x64xf32>
    %28 = arith.mulf %26, %27 : vector<16x64xf32>
    %29 = vector.broadcast %8 : vector<1x64xf32> to vector<16x64xf32>
    %30 = arith.addf %28, %29 : vector<16x64xf32>
    %c0_15 = arith.constant 0 : index
    %c0_16 = arith.constant 0 : index
    %c0_17 = arith.constant 0 : index
    %31 = vector.load %arg6[%c0_15, %c0_16, %c0_17] : memref<1x16x64xf32, #tpu.memory_space<vmem>>, vector<1x16x64xf32>
    %32 = vector.shape_cast %31 : vector<1x16x64xf32> to vector<16x64xf32>
    %33 = vector.shape_cast %30 : vector<16x64xf32> to vector<1x16x64xf32>
    tpu.vector_store %arg6[%c0_15, %c0_16, %c0_17], %33 {strides = array<i32>} : memref<1x16x64xf32, #tpu.memory_space<vmem>>, vector<1x16x64xf32>,
    return
  }
  func.func @transform_0(%arg0: i32) -> (i32, i32, i32) {
    %c0_i32 = arith.constant 0 : i32
    %c0_i32_0 = arith.constant 0 : i32
    %c0_i32_1 = arith.constant 0 : i32
    return %arg0, %c0_i32, %c0_i32_0 : i32, i32, i32
  }
  func.func @transform_1(%arg0: i32) -> (i32, i32, i32) {
    %c0_i32 = arith.constant 0 : i32
    %c0_i32_0 = arith.constant 0 : i32
    %c0_i32_1 = arith.constant 0 : i32
    return %arg0, %c0_i32, %c0_i32_0 : i32, i32, i32
  }
  func.func @transform_2(%arg0: i32) -> (i32, i32) {
    %c0_i32 = arith.constant 0 : i32
    %c0_i32_0 = arith.constant 0 : i32
    %c0_i32_1 = arith.constant 0 : i32
    return %c0_i32, %c0_i32_0 : i32, i32
  }
  func.func @transform_3(%arg0: i32) -> (i32, i32) {
    %c0_i32 = arith.constant 0 : i32
    %c0_i32_0 = arith.constant 0 : i32
    %c0_i32_1 = arith.constant 0 : i32
    return %c0_i32, %c0_i32_0 : i32, i32
  }
  func.func @transform_4(%arg0: i32) -> (i32, i32) {
    %c0_i32 = arith.constant 0 : i32
    %c0_i32_0 = arith.constant 0 : i32
    %c0_i32_1 = arith.constant 0 : i32
    return %c0_i32, %c0_i32_0 : i32, i32
  }
  func.func @transform_5(%arg0: i32) -> (i32, i32, i32) {
    %c0_i32 = arith.constant 0 : i32
    %c0_i32_0 = arith.constant 0 : i32
    %c0_i32_1 = arith.constant 0 : i32
    return %arg0, %c0_i32, %c0_i32_0 : i32, i32, i32
  }
}

</mosaic_0001>

<bundles_post_ra>
// kernel: tpu_custom_call.1
= control target key start
LH: loop header
LB: loop body
LE: loop exit
PB: predicated region body
PF: predicated region fallthrough
CT: control target
= control target key end

     0   :  { %s1041_s0 = inlined_call_operand.hbm [shape: f32[2,16,64], index: 0, kind: input, shape index: {}]   ;;  %s1042_s1 = inlined_call_operand.hbm [shape: f32[2,16,64], index: 1, kind: input, shape index: {}]   ;;  %s1043_s2 = inlined_call_operand.hbm [shape: f32[16,64], index: 2, kind: input, shape index: {}]   ;;  %s1044_s3 = inlined_call_operand.vmem [shape: f32[1,64], index: 3, kind: input, shape index: {}]   ;;  %s1045_s4 = inlined_call_operand.vmem [shape: f32[1,64], index: 4, kind: input, shape index: {}]   ;;  %s1046_s5 = inlined_call_operand.hbm [shape: f32[2,16,64], index: 5, kind: output, shape index: {}]  }
   0x1   :  { %1055 = sst [smem:[#allocation15_spill]] %s1041_s0 }
   0x2   :  { %1056 = sst [smem:[#allocation16_spill]] %s1043_s2 }
   0x3   :  { %10 = vsyncpa [#allocation3], 0 }
   0x4   :  { %12 = vsyncpa [#allocation3 + $0x1], 0 }
   0x5   :  { %13 = vsyncpa [#allocation6], 0 }
   0x6   :  { %15 = vsyncpa [#allocation6 + $0x1], 0 }
   0x7   :  { %16 = vsyncpa [#allocation4], 0 }
   0x8   :  { %18 = vsyncpa [#allocation4 + $0x1], 0  ;;  %s771_s18 = smov 0   ;;  %s773_s19 = smov 0  }
   0x9   :  { %s775_s20 = smov 0   ;;  %s777_s21 = smov 0  }
   0xa LB: > { %1057 = sst [smem:[#allocation13_spill]] %s727_s20  ;;  %s792_s22 = sadd.s32 4294967295, %s731_s21   ;;  %s731_s21 = sphi %s777_s21, %s1080_s21   ;;  %s727_s20 = sphi %s775_s20, %s1077_s20   ;;  %s723_s19 = sphi %s773_s19, %s1079_s19   ;;  %s719_s18 = sphi %s771_s18, %s1078_s18  }
   0xb   : > { %s474_s23 = sadd.s32 4294967294, %s731_s21   ;;  %p44_p0 = scmp.ne.s32.totalorder %s723_s19, %s719_s18 }
   0xc   : > { %p1047_p1 = scmp.eq.s32.totalorder %s792_s22, 0  ;;  %p163_p3 = scmp.eq.s32.totalorder %s474_s23, 1 }
   0xd   : > { %p475_p5 = scmp.ge.s32.totalorder %s731_s21, 1  ;;  %p170_p7 = scmp.lt.s32.totalorder %s731_s21, 3 }
   0xe   : > { %p801_p4 = por %p1047_p1, %p44_p0  ;;  %p806_p6 = por %p163_p3, %p44_p0 }
   0xf   : > { %p811_p8 = pnand %p475_p5, %p170_p7  ;;  %s733_s27 = smov [#allocation7]  }
  0x10   : > { %s1058_s24 = scalar_select %p801_p4, 1, 0 }
  0x11   : > { %s1059_s25 = scalar_select %p806_p6, 1, 0 }
  0x12   : > { %s1060_s26 = scalar_select %p811_p8, 1, 0 }
  0x13   : > { %s182_s28 = sshll.u32 %s733_s27, 4  ;;  %p509_p9 = pneg %p811_p8  ;;  %s815_s28 = int_to_ptr.vmem [resolvable:$true] %s182_s28 }
  0x14   : > { %s827_s30 = sadd.s32 1, %s731_s21   ;;  %s31_s6 = sadd.s32 1, %s727_s20 }
  0x15   : > { %p822_p11 = pnand %p509_p9, %p1047_p1  ;;  %s28_s7 = ssub.s32 %s731_s21, %s827_s30 }
  0x16   : > { %s1062_s2 = sld [smem:[#allocation16_spill]] }
  0x17   : > { %p571_p13 = pneg %p822_p11 }
  0x1c   : > { %s569_s10 = scalar_lea.hbm %s1062_s2, 256 }
  0x1d   : > { %p570_p12 = scmp.ne.s32.totalorder %s1062_s2, %s569_s10  ;;  %p576_p5 = scmp.lt.u32.totalorder %s569_s10, %s1062_s2 }
  0x1f   : > { %p572_p0 = pnand %p571_p13, %p570_p12 }
  0x21   : > { %p573_p3 = pneg %p572_p0 }
  0x23   : > { %p578_p7 = pnand %p576_p5, %p573_p3 }
  0x25   : > { %581 = shalt.err (!%p578_p7)
}
  0x26   : > { %s582_s15 = scalar_lea.vmem %s815_s28, 256  ;;  %p590_p2 = scmp.lt.s32.totalorder %s815_s28, %s815_s28 }
  0x27   : > { %p583_p9 = scmp.ne.s32.totalorder %s815_s28, %s582_s15  ;;  %p591_p6 = scmp.lt.s32.totalorder %s582_s15, %s582_s15 }
  0x29   : > { %p585_p10 = pnand %p583_p9, %p571_p13  ;;  %p592_p4 = por %p591_p6, %p590_p2 }
  0x2b   : > { %p586_p1 = pneg %p585_p10 }
  0x2d   : > { %p593_p8 = pnand %p592_p4, %p586_p1 }
  0x2f   : > { %596 = shalt.err (!%p593_p8)
}
  0x30   : > { %s1050_s16 = smov 128   ;;  %s1052_s17 = smov 8  }
  0x31   : > { %512 = dma.hbm_to_vmem [thread:$0]  (!%p822_p11), %s1062_s2, 256, %s815_s28, [#allocation6], %s1050_s16, %s1050_s16, %s1052_s17  }
  0x32   : > { %p29_p1 = scmp.eq.s32.totalorder %s28_s7, 0  ;;  %p38_p2 = scmp.ne.s32.totalorder %s727_s20, %s723_s19 }
  0x33   : > { %p39_p4 = scmp.eq.s32.totalorder %s731_s21, 0  ;;  %p525_p6 = scmp.lt.s32.totalorder %s731_s21, 2 }
  0x34   : > { %s861_s8 = scalar_select %p29_p1, %s727_s20, %s31_s6  }
  0x35   : > { %p40_p8 = por %p39_p4, %p38_p2  ;;  %p1064_p10 = scmp.eq.s32.totalorder %s792_s22, 1 }
  0x36   : > { %1063 = sst [smem:[#allocation14_spill]] %s861_s8  ;;  %s202_s29 = sand.u32 1, %s727_s20  }
  0x37   : > { %p865_p12 = por %p1064_p10, %p38_p2  ;;  %s496_s10 = sshll.u32 %s731_s21, 8 }
  0x38   : > { %s871_s11 = sshll.u32 %s202_s29, 4  ;;  %s1066_s0 = sld [smem:[#allocation15_spill]] }
  0x39   : > { %s206_s6 = scalar_lea.vmem [#allocation2], %s871_s11  ;;  %p879_p11 = pnand %p525_p6, %p40_p8 }
  0x3a   : > { %s213_s7 = sshll.u32 %s206_s6, 4  ;;  %s888_s27 = scalar_lea.hbm %s1042_s1, %s496_s10  ;;  %s883_s7 = int_to_ptr.vmem [resolvable:$true] %s213_s7 }
  0x3b   : > { %s890_s12 = scalar_lea.sflag [#allocation3], %s202_s29  ;;  %p599_p0 = pneg %p879_p11 }
  0x3e   : > { %s876_s28 = scalar_lea.hbm %s1066_s0, %s496_s10  ;;  %s602_s17 = scalar_lea.hbm %s1066_s0, 512 }
  0x3f   : > { %s597_s13 = scalar_lea.hbm %s876_s28, 256  ;;  %p603_p7 = scmp.lt.u32.totalorder %s876_s28, %s1066_s0 }
  0x40   : > { %p598_p13 = scmp.ne.s32.totalorder %s876_s28, %s597_s13  ;;  %p604_p9 = scmp.lt.u32.totalorder %s602_s17, %s597_s13 }
  0x41   : > { %p606_p2 = scmp.lt.u32.totalorder %s597_s13, %s876_s28 }
  0x42   : > { %p600_p3 = pnand %p599_p0, %p598_p13  ;;  %p605_p1 = por %p604_p9, %p603_p7 }
  0x44   : > { %p601_p5 = pneg %p600_p3  ;;  %p607_p4 = por %p606_p2, %p605_p1 }
  0x46   : > { %p608_p6 = pnand %p607_p4, %p601_p5 }
  0x48   : > { %611 = shalt.err (!%p608_p6)
}
  0x49   : > { %s612_s29 = scalar_lea.vmem %s883_s7, 256  ;;  %s736_s16 = smov [#allocation2]  }
  0x4a   : > { %p613_p8 = scmp.ne.s32.totalorder %s883_s7, %s612_s29  ;;  %s617_s10 = sshll.u32 %s736_s16, 4  ;;  %s618_s10 = int_to_ptr.vmem [resolvable:$false] %s617_s10 }
  0x4b   : > { %s619_s2 = scalar_lea.vmem %s618_s10, 512  ;;  %p620_p3 = scmp.lt.s32.totalorder %s883_s7, %s618_s10 }
  0x4c   : > { %p615_p10 = pnand %p613_p8, %p599_p0  ;;  %p621_p7 = scmp.lt.s32.totalorder %s619_s2, %s612_s29 }
  0x4e   : > { %p616_p13 = pneg %p615_p10  ;;  %p622_p9 = por %p621_p7, %p620_p3 }
  0x50   : > { %p623_p1 = pnand %p622_p9, %p616_p13 }
  0x52   : > { %626 = shalt.err (!%p623_p1)
}
  0x53   : > { %s1068_s17 = smov 8   ;;  %s1069_s8 = smov 128  }
  0x54   : > { %516 = dma.hbm_to_vmem [thread:$0]  (!%p879_p11), %s876_s28, 256, %s883_s7, %s890_s12, %s1069_s8, %s1069_s8, %s1068_s17  }
  0x55   : > { %s227_s15 = scalar_lea.vmem [#allocation5], %s871_s11  ;;  %s223_s13 = sand.u32 1, %s731_s21  }
  0x56   : > { %s234_s23 = sshll.u32 %s227_s15, 4  ;;  %s925_s6 = scalar_lea.sflag [#allocation6], %s223_s13  ;;  %s923_s23 = int_to_ptr.vmem [resolvable:$true] %s234_s23 }
  0x57   : > { %s627_s29 = scalar_lea.hbm %s888_s27, 256  ;;  %s632_s2 = scalar_lea.hbm %s1042_s1, 512 }
  0x58   : > { %p628_p5 = scmp.ne.s32.totalorder %s888_s27, %s627_s29  ;;  %p633_p6 = scmp.lt.u32.totalorder %s888_s27, %s1042_s1 }
  0x59   : > { %p634_p8 = scmp.lt.u32.totalorder %s632_s2, %s627_s29  ;;  %p636_p13 = scmp.lt.u32.totalorder %s627_s29, %s888_s27 }
  0x5a   : > { %p630_p2 = pnand %p628_p5, %p599_p0 }
  0x5b   : > { %p635_p10 = por %p634_p8, %p633_p6 }
  0x5c   : > { %p631_p4 = pneg %p630_p2 }
  0x5d   : > { %p637_p3 = por %p636_p13, %p635_p10 }
  0x5f   : > { %p638_p7 = pnand %p637_p3, %p631_p4 }
  0x61   : > { %641 = shalt.err (!%p638_p7)
}
  0x62   : > { %s642_s11 = scalar_lea.vmem %s923_s23, 256  ;;  %s737_s28 = smov [#allocation5]  }
  0x63   : > { %p643_p9 = scmp.ne.s32.totalorder %s923_s23, %s642_s11  ;;  %s647_s7 = sshll.u32 %s737_s28, 4  ;;  %s648_s7 = int_to_ptr.vmem [resolvable:$false] %s647_s7 }
  0x64   : > { %s649_s0 = scalar_lea.vmem %s648_s7, 512  ;;  %p650_p2 = scmp.lt.s32.totalorder %s923_s23, %s648_s7 }
  0x65   : > { %p645_p1 = pnand %p643_p9, %p599_p0  ;;  %p651_p6 = scmp.lt.s32.totalorder %s649_s0, %s642_s11 }
  0x67   : > { %p646_p5 = pneg %p645_p1  ;;  %p652_p8 = por %p651_p6, %p650_p2 }
  0x69   : > { %p653_p10 = pnand %p652_p8, %p646_p5 }
  0x6b   : > { %656 = shalt.err (!%p653_p10)
}
  0x6c   : > { %519 = dma.hbm_to_vmem [thread:$0]  (!%p879_p11), %s888_s27, 256, %s923_s23, %s925_s6, %s1069_s8, %s1069_s8, %s1068_s17  }
  0x6d   : > { %p1070_p0 = scmp.ne.s32.totalorder %s1060_s26, 0 }
  0x6e   : > { %s957_s20 = sand.u32 (!%p1070_p0), 1, %s723_s19   ;;  %p1071_p4 = scmp.ne.s32.totalorder (!%p1070_p0), %s1058_s24, 0 }
  0x6f   : > { %246 = sbr.rel (%p1070_p0) target bundleno = 463 (0x1cf), region = 40  ;;  %s960_s12 = sshll.u32 (!%p1070_p0), %s957_s20, 4 }
  0x70   : > { %s249_s14 = scalar_lea.sflag (!%p1070_p0), [#allocation3], %s957_s20  ;;  %s252_s15 = scalar_lea.vmem (!%p1070_p0), [#allocation2], %s960_s12 }
  0x76   : > { %702 = dma.done.wait (%p1071_p4), %s249_s14, 256  }
  0x77   : > { %704 = vsyncadd (%p1071_p4), %s249_s14, 4294967040  ;;  %s257_s26 = sand.u32 1, %s792_s22   ;;  %s261_s17 = scalar_lea.vmem [#allocation5], %s960_s12 }
  0x78   : > { %s258_s27 = scalar_lea.sflag [#allocation6], %s257_s26 }
  0x79   : > { %706 = dma.done.wait (%p1071_p4), %s258_s27, 256  }
  0x7a   : > { %708 = vsyncadd (%p1071_p4), %s258_s27, 4294967040  ;;  %p1072_p11 = scmp.eq.s32.totalorder %s792_s22, 0 }
  0x7c   : > { %710 = dma.done.wait (%p1072_p11), [#allocation6], 256   ;;  %p1073_p13 = pmov %p1072_p11 }
  0x7d   : > { %v297_v0 = vld [vmem:[%s252_s15] sm:$0xff]  ;;  %v298_v4 = vld [vmem:[%s252_s15 + $0x8] sm:$0xff]  ;;  %vm309_vm0 = vcmask 523264   ;;  %s498_s6 = sshll.u32 %s792_s22, 8  ;;  %s296_s29 = scalar_lea.vmem [#allocation8], %s960_s12 }
  0x7e   : > { %712 = vsyncadd (%p1073_p13), [#allocation6], 4294967040  ;;  %v299_v1 = vld [vmem:[%s261_s17] sm:$0xff]  ;;  %v300_v5 = vld [vmem:[%s261_s17 + $0x8] sm:$0xff]  ;;  %s369_s16 = sshll.u32 %s296_s29, 4  ;;  %s994_s11 = scalar_lea.hbm %s1046_s5, %s498_s6  ;;  %s996_s16 = int_to_ptr.vmem [resolvable:$true] %s369_s16 }
  0x7f   : > { %v303_v2 = vld [vmem:[#allocation7] sm:$0xff]  ;;  %v301_v3 = vadd.f32 %v299_v1, %v297_v0  ;;  %v304_v6 = vld [vmem:[#allocation7 + $0x8] sm:$0xff]  ;;  %v302_v7 = vadd.f32 %v300_v5, %v298_v4  ;;  %s356_s28 = scalar_lea.sflag [#allocation4], %s957_s20  ;;  %s657_s22 = scalar_lea.vmem %s996_s16, 256 }
  0x80   : > { %v489_v29 = vld [vmem:[%s1044_s3] ss:$0 sm:$0xff]  ;;  %p658_p3 = scmp.ne.s32.totalorder %s996_s16, %s657_s22  ;;  %s738_s7 = smov [#allocation8]  }
  0x81   : > { %v305_v8 = vadd.f32 %v303_v2, %v301_v3  ;;  %v306_v9 = vadd.f32 %v304_v6, %v302_v7  ;;  %v490_v31 = vld [vmem:[%s1045_s4] ss:$0 sm:$0xff]  ;;  %s661_s0 = sshll.u32 %s738_s7, 4  ;;  %s662_s0 = int_to_ptr.vmem [resolvable:$false] %s661_s0 }
  0x82   : > { %p659_p7 = pnand %p658_p3, %p865_p12  ;;  %s663_s12 = scalar_lea.vmem %s662_s0, 512 }
  0x83   : > { %v310_v10 = vsel %vm309_vm0, %v305_v8, 0.0  ;;  %v313_v11 = vsel %vm309_vm0, %v306_v9, 0.0  ;;  %p664_p1 = scmp.lt.s32.totalorder %s996_s16, %s662_s0  ;;  %p665_p5 = scmp.lt.s32.totalorder %s663_s12, %s657_s22 }
  0x84   : > { %311 = vadd.xlane.f32.xlu0 %v310_v10  ;;  %p660_p9 = pneg %p659_p7 }
  0x85   : > { %p666_p2 = por %p665_p5, %p664_p1 }
  0x87   : > { %p667_p6 = pnand %p666_p2, %p660_p9 }
  0x88   : > { %314 = vadd.xlane.f32.xlu0 %v313_v11 }
 0x111   : > { %v312_v12 = vpop.xlane.xlu0 %311 }
 0x112   : > { %v317_v13 = vmul.f32 0.015625, %v312_v12 }
 0x114   : > { %v319_v14 = vsub.f32 %v305_v8, %v317_v13 }
 0x115   : > { %v315_v15 = vpop.xlane.xlu0 %314 }
 0x116   : > { %v318_v16 = vmul.f32 0.015625, %v315_v15  ;;  %v321_v17 = vmul.f32 %v319_v14, %v319_v14 }
 0x118   : > { %v320_v18 = vsub.f32 %v306_v9, %v318_v16  ;;  %v323_v19 = vsel %vm309_vm0, %v321_v17, 0.0 }
 0x119   : > { %324 = vadd.xlane.f32.xlu1 %v323_v19 }
 0x11a   : > { %v322_v20 = vmul.f32 %v320_v18, %v320_v18 }
 0x11c   : > { %v326_v21 = vsel %vm309_vm0, %v322_v20, 0.0 }
 0x11d   : > { %327 = vadd.xlane.f32.xlu1 %v326_v21 }
 0x1a6   : > { %v325_v22 = vpop.xlane.xlu1 %324 }
 0x1a7   : > { %v329_v23 = vmul.f32 0.015625, %v325_v22 }
 0x1a9   : > { %v331_v24 = vadd.f32 1e-12, %v329_v23 }
 0x1aa   : > { %v328_v25 = vpop.xlane.xlu1 %327 }
 0x1ab   : > { %565 = vrsqrt.f32 %v331_v24  ;;  %v330_v26 = vmul.f32 0.015625, %v328_v25 }
 0x1ad   : > { %v332_v27 = vadd.f32 1e-12, %v330_v26 }
 0x1af   : > { %567 = vrsqrt.f32 %v332_v27 }
 0x1b5   : > { %v566_v28 = vpop.eup %565 }
 0x1b6   : > { %v335_v30 = vmul.f32 %v566_v28, %v319_v14 }
 0x1b8   : > { %v343_v32 = vmul.f32 %v489_v29, %v335_v30 }
 0x1b9   : > { %v568_v33 = vpop.eup %567 }
 0x1ba   : > { %v351_v34 = vadd.f32 %v490_v31, %v343_v32  ;;  %v336_v35 = vmul.f32 %v568_v33, %v320_v18 }
 0x1bc   : > { %v344_v36 = vmul.f32 %v489_v29, %v336_v35  ;;  %353 = vst.msk [vmem:[%s296_s29] sm:$0xff] %vm309_vm0, %v351_v34 }
 0x1be   : > { %v352_v37 = vadd.f32 %v490_v31, %v344_v36 }
 0x1c0   : > { %354 = vst.msk [vmem:[%s296_s29 + $0x8] sm:$0xff] %vm309_vm0, %v352_v37 }
 0x1c1   : > { %670 = shalt.err (!%p667_p6)
}
 0x1c2   : > { %s671_s14 = scalar_lea.hbm %s994_s11, 256  ;;  %s675_s27 = scalar_lea.hbm %s1046_s5, 512 }
 0x1c3   : > { %p672_p8 = scmp.ne.s32.totalorder %s994_s11, %s671_s14  ;;  %p676_p4 = scmp.lt.u32.totalorder %s994_s11, %s1046_s5 }
 0x1c4   : > { %p677_p11 = scmp.lt.u32.totalorder %s675_s27, %s671_s14  ;;  %p679_p3 = scmp.lt.u32.totalorder %s671_s14, %s994_s11 }
 0x1c5   : > { %p673_p10 = pnand %p672_p8, %p865_p12 }
 0x1c6   : > { %p678_p13 = por %p677_p11, %p676_p4 }
 0x1c7   : > { %p674_p0 = pneg %p673_p10 }
 0x1c8   : > { %p680_p7 = por %p679_p3, %p678_p13 }
 0x1ca   : > { %p681_p9 = pnand %p680_p7, %p674_p0 }
 0x1cc   : > { %684 = shalt.err (!%p681_p9)
}
 0x1cd   : > { %s739_s8 = smov 128   ;;  %s740_s23 = smov 8  }
 0x1ce   : > { %507 = dma.vmem_to_hbm [thread:$0]  (%p865_p12), %s996_s16, 256, %s994_s11, %s356_s28, %s739_s8, %s739_s8, %s740_s23  }
 0x1cf PF: > { %s384_s13 = sand.u32 1, %s719_s18   ;;  %p1074_p1 = scmp.ne.s32.totalorder %s1059_s25, 0 }
 0x1d0   : > { %p1075_p5 = scmp.ge.s32.totalorder %s731_s21, 2  ;;  %s385_s6 = scalar_lea.sflag [#allocation4], %s384_s13 }
 0x1d2   : > { %p521_p2 = pnand %p1075_p5, %p1074_p1 }
 0x1d4   : > { %714 = dma.done.wait (!%p521_p2), %s385_s6, 256  }
 0x1d5   : > { %716 = vsyncadd (!%p521_p2), %s385_s6, 4294967040  ;;  %s1076_s29 = sld [smem:[#allocation13_spill]]  ;;  %s1077_s20 = sld [smem:[#allocation14_spill]] }
 0x1d6   : > { %p21_p6 = scmp.ge.s32.totalorder %s827_s30, 4   ;;  %s1078_s18 = smov %s723_s19 }
 0x1d7   : > { %s1080_s21 = smov %s827_s30 }
 0x1d8   :  { %23 = sbr.rel (!%p21_p6) target bundleno = 10 (0xa), region = 102 }
 0x1db   : > { %s1079_s19 = smov %s1076_s29 }
 0x1df   :  { %390 = vsyncpa [#allocation3], 1 }
 0x1e0   :  { %392 = vsyncpa [#allocation3 + $0x1], 1 }
 0x1e1   :  { %393 = vsyncpa [#allocation6], 1 }
 0x1e2   :  { %395 = vsyncpa [#allocation6 + $0x1], 1 }
 0x1e3   :  { %396 = vsyncpa [#allocation4], 1 }
 0x1e4   :  { %398 = vsyncpa [#allocation4 + $0x1], 1 }

</bundles_post_ra>
